<compile_context>
chip_gen: v7x
topology: tpu7x:2x2x1
jax: 0.10.0
libtpu: 0.0.40
codegen_flags: <defaults>
</compile_context>

<pallas_src>
import jax
import jax.numpy as jnp
from jax import lax
from jax.experimental import pallas as pl
from jax.experimental.pallas import tpu as pltpu

GAMMA = 2             # FocalLoss default (gamma=2 -> two multiplies in-kernel)
IGNORE_INDEX = 255    # FocalLoss default

_VMEM_BUDGET_BYTES = 32 * 1024 * 1024   # working-set target for tile sizing
_VMEM_LIMIT_BYTES = 48 * 1024 * 1024    # scoped VMEM limit (< v7x 64 MiB phys)


def _focal_tile(x, t, valid):
    """Focal-NLL on one tile.

    x:     (C, TP, TL) float32 logits
    t:     (TP, TL)    int32 targets
    valid: (TP, TL)    bool  (not ignore_index AND inside the real pixel range)
    Returns (masked per-pixel loss, masked per-pixel count), both float32.
    """
    # Numerically stable log-softmax pieces, reduced over the *leading* class
    # axis (non-layout axis -> plain elementwise VPU adds, no cross-sublane XLU).
    m = jnp.max(x, axis=0)                                   # (TP, TL)
    z = x - m[None]                                          # (C, TP, TL)
    lse = jnp.log(jnp.sum(jnp.exp(z), axis=0))               # (TP, TL)

    # Gather z at the target class with a one-hot over the class axis.
    # TODO(synk): out-of-range targets (t >= C and t != 255) silently give
    # z_t = 0 and count as valid; PyTorch NLLLoss would raise on such input.
    t_safe = jnp.where(valid, t, 0)
    cls = lax.broadcasted_iota(jnp.int32, x.shape, 0)        # (C, TP, TL)
    onehot = cls == t_safe[None]
    z_t = jnp.sum(jnp.where(onehot, z, 0.0), axis=0)         # (TP, TL)

    logp_t = z_t - lse                 # log_softmax(x)[target]
    p_t = jnp.exp(logp_t)              # softmax(x)[target]
    one_m = 1.0 - p_t
    focal_t = one_m * one_m * logp_t   # gamma = 2

    loss = jnp.where(valid, -focal_t, 0.0)
    cnt = valid.astype(jnp.float32)
    return loss, cnt


def _make_kernel(hw_total, lanes_total, jp, grid_on_rows):
    """Kernel over (1, C, TP, TL) logit blocks / (1, TP, TL) target blocks."""

    def kernel(x_ref, t_ref, sum_ref, cnt_ref):
        j = pl.program_id(2)

        @pl.when(j == 0)
        def _():
            sum_ref[...] = jnp.zeros_like(sum_ref)
            cnt_ref[...] = jnp.zeros_like(cnt_ref)

        x = x_ref[0].astype(jnp.float32)       # (C, TP, TL), f32 accumulation
        t = t_ref[0].astype(jnp.int32)         # (TP, TL), widened on-chip
        tp, tl = t.shape

        # Raw (unclamped) pixel-block index for this step.  Blocks (or block
        # tails) whose pixels fall past HW contribute nothing -- the mask is
        # derived from indices, never from out-of-bounds target values.
        blk = pl.program_id(1) * jp + j
        r = lax.broadcasted_iota(jnp.int32, t.shape, 0)
        l = lax.broadcasted_iota(jnp.int32, t.shape, 1)
        if grid_on_rows:
            pix = (blk * tp + r) * lanes_total + l
        else:
            pix = blk * tl + l
        valid = (t != IGNORE_INDEX) & (pix < hw_total)

        loss, cnt = _focal_tile(x, t, valid)
        sum_ref[0, 0] += loss
        cnt_ref[0, 0] += cnt

    return kernel


def _pick_pixels_per_block(C, in_bytes, t_bytes):
    # Conservative per-pixel VMEM estimate: double-buffered logits stream,
    # f32 temporaries over the (C, ...) tile, double-buffered targets plus the
    # widened copy, per-pixel f32 vectors and double-buffered accumulators.
    per_pixel = 2 * C * in_bytes + 6 * C * 4 + 2 * t_bytes + 4 + 6 * 4 + 16
    return max(128, _VMEM_BUDGET_BYTES // per_pixel)


def focal_loss(inputs, targets, max_pixels_per_block=None):
    """inputs: (N, C, H, W) float logits; targets: (N, H, W) int class ids.

    Matches FocalLoss(gamma=2, weight=None, size_average=True,
    ignore_index=255).  Targets may be any integer dtype; they are streamed at
    native width and widened on-chip.
    """
    N, C, H, W = inputs.shape
    HW = H * W

    # Zero-copy pixel view (minor-dim split only): pixels on (sublane, lane).
    if HW % 128 == 0:
        R, L = HW // 128, 128
        grid_on_rows = True
    else:                      # ragged HW: flat lane tiling fallback, no pad
        R, L = 1, HW
        grid_on_rows = False

    x = inputs.reshape(N, C, R, L)     # free reshape, no HBM transpose/copy
    t = targets.reshape(N, R, L)       # native dtype, no int32 cast here

    in_bytes = jnp.dtype(inputs.dtype).itemsize
    t_bytes = jnp.dtype(targets.dtype).itemsize
    if max_pixels_per_block is None:
        max_pixels_per_block = _pick_pixels_per_block(C, in_bytes, t_bytes)

    # Tile shape (TP rows x TL lanes) honoring the (8, 128) blocking rules.
    if grid_on_rows:
        TL = 128
        if R <= 8:
            TP = R
        else:
            rows = max(8, min(R, max_pixels_per_block // 128))
            TP = R if rows >= R else (rows // 8) * 8
        j_total = pl.cdiv(R, TP)
    else:
        TP = 1
        if L <= 128:
            TL = L
        else:
            cols = max(128, min(L, max_pixels_per_block))
            TL = L if cols >= L else (cols // 128) * 128
        j_total = pl.cdiv(L, TL)

    # Optional parallel pixel split so both v7x TensorCores get work when the
    # batch alone cannot be sharded.  Neutral on single-TC chips.
    P = 2 if (N == 1 and j_total >= 2) else 1
    jp = pl.cdiv(j_total, P)

    def pix_block(p, j):
        # Clamp the DMA'd block into range; the kernel masks any duplicated
        # tail step out via the *unclamped* pixel index.
        return jnp.minimum(p * jp + j, j_total - 1)

    if grid_on_rows:
        x_map = lambda n, p, j: (n, 0, pix_block(p, j), 0)
        t_map = lambda n, p, j: (n, pix_block(p, j), 0)
    else:
        x_map = lambda n, p, j: (n, 0, 0, pix_block(p, j))
        t_map = lambda n, p, j: (n, 0, pix_block(p, j))

    kernel = _make_kernel(HW, L, jp, grid_on_rows)

    loss_sum, cnt = pl.pallas_call(
        kernel,
        out_shape=(
            jax.ShapeDtypeStruct((N, P, TP, TL), jnp.float32),
            jax.ShapeDtypeStruct((N, P, TP, TL), jnp.float32),
        ),
        grid_spec=pltpu.PrefetchScalarGridSpec(
            num_scalar_prefetch=0,
            grid=(N, P, jp),
            in_specs=[
                pl.BlockSpec((1, C, TP, TL), x_map),
                pl.BlockSpec((1, TP, TL), t_map),
            ],
            out_specs=(
                pl.BlockSpec((1, 1, TP, TL), lambda n, p, j: (n, p, 0, 0)),
                pl.BlockSpec((1, 1, TP, TL), lambda n, p, j: (n, p, 0, 0)),
            ),
        ),
        compiler_params=pltpu.CompilerParams(
            dimension_semantics=("parallel", "parallel", "arbitrary"),
            vmem_limit_bytes=_VMEM_LIMIT_BYTES),
    )(x, t)

    # size_average=True -> mean over non-ignored targets (weight=None).
    # (Division by zero if *every* pixel is ignored matches the reference.)
    return jnp.sum(loss_sum) / jnp.sum(cnt)


def focal_loss_ref(inputs, targets):
    """Pure-JAX reference matching the PyTorch module semantics."""
    N, C, H, W = inputs.shape
    x = jnp.transpose(inputs, (0, 2, 3, 1)).reshape(-1, C).astype(jnp.float32)
    t = targets.reshape(-1).astype(jnp.int32)
    logp = jax.nn.log_softmax(x, axis=-1)
    p = jnp.exp(logp)
    focal = (1.0 - p) ** GAMMA * logp
    valid = t != IGNORE_INDEX
    t_safe = jnp.where(valid, t, 0)
    picked = jnp.take_along_axis(focal, t_safe[:, None], axis=-1)[:, 0]
    return jnp.sum(jnp.where(valid, -picked, 0.0)) / jnp.sum(valid)


if __name__ == "__main__":
    key = jax.random.PRNGKey(0)

    def make_case(k, N, C, H, W, t_dtype):
        k_x, k_t, k_m = jax.random.split(k, 3)
        xs = jax.random.normal(k_x, (N, C, H, W), dtype=jnp.float32)
        ts = jax.random.randint(k_t, (N, H, W), 0, C, dtype=jnp.int32)
        ign = jax.random.bernoulli(k_m, 0.1, (N, H, W))
        ts = jnp.where(ign, IGNORE_INDEX, ts).astype(t_dtype)
        return xs, ts

    k1, k2, k3 = jax.random.split(key, 3)

    # Main case (spec shapes): HW % 128 == 0 -> (C, TP, 128) layout; uint8
    # targets streamed at native width and widened on-chip.
    x, t = make_case(k1, 2, 4, 16, 16, jnp.uint8)
    out = jax.block_until_ready(focal_loss(x, t))
    ref = focal_loss_ref(x, t)
    assert jnp.allclose(out, ref, rtol=1e-5, atol=1e-5), (out, ref)

    # Ragged HW (not a multiple of 128): flat lane tiling across several lane
    # blocks with an in-kernel tail mask (no jnp.pad of the logits).
    x, t = make_case(k2, 2, 5, 15, 20, jnp.int32)
    out = jax.block_until_ready(focal_loss(x, t, max_pixels_per_block=128))
    ref = focal_loss_ref(x, t)
    assert jnp.allclose(out, ref, rtol=1e-5, atol=1e-5), (out, ref)

    # N == 1: parallel pixel split (P=2) with an odd block count -- exercises
    # the clamped index map + fully-masked duplicate step and a partial row
    # block at the edge.
    x, t = make_case(k3, 1, 4, 48, 48, jnp.int32)
    out = jax.block_until_ready(focal_loss(x, t, max_pixels_per_block=1024))
    ref = focal_loss_ref(x, t)
    assert jnp.allclose(out, ref, rtol=1e-5, atol=1e-5), (out, ref)

    print("KERNEL_OK")
</pallas_src>

<mosaic_0001>
module attributes {stable_mosaic.version = 11 : i64} {
  func.func @kernel(%arg0: i32, %arg1: i32, %arg2: i32, %arg3: memref<1x4x2x128xf32, #tpu.memory_space<vmem>>, %arg4: memref<1x2x128xi8, #tpu.memory_space<vmem>>, %arg5: memref<1x1x2x128xf32, #tpu.memory_space<vmem>>, %arg6: memref<1x1x2x128xf32, #tpu.memory_space<vmem>>) attributes {dimension_semantics = [#tpu.dimension_semantics<parallel>, #tpu.dimension_semantics<parallel>, #tpu.dimension_semantics<arbitrary>], iteration_bounds = array<i64: 2, 1, 1>, scalar_prefetch = 0 : i64, scratch_operands = 0 : i64, tpu.core_type = #tpu.core_type<tc>, window_params = [{transform_indices = @transform_0, window_bounds = array<i64: 1, 4, 2, 128>}, {transform_indices = @transform_1, window_bounds = array<i64: 1, 2, 128>}, {transform_indices = @transform_2, window_bounds = array<i64: 1, 1, 2, 128>}, {transform_indices = @transform_3, window_bounds = array<i64: 1, 1, 2, 128>}]} {
    %c0_i32 = arith.constant 0 : i32
    %0 = arith.cmpi eq, %arg2, %c0_i32 : i32
    %1 = arith.extui %0 : i1 to i32
    %c0_i32_0 = arith.constant 0 : i32
    %2 = arith.cmpi ne, %1, %c0_i32_0 : i32
    scf.if %2 {
      %cst_30 = arith.constant 0.000000e+00 : f32
      %63 = vector.broadcast %cst_30 : f32 to vector<1x1x2x128xf32>
      %c0_31 = arith.constant 0 : index
      %c0_32 = arith.constant 0 : index
      %c0_33 = arith.constant 0 : index
      %c0_34 = arith.constant 0 : index
      %64 = vector.load %arg5[%c0_31, %c0_32, %c0_33, %c0_34] : memref<1x1x2x128xf32, #tpu.memory_space<vmem>>, vector<1x1x2x128xf32>
      tpu.vector_store %arg5[%c0_31, %c0_32, %c0_33, %c0_34], %63 {strides = array<i32>} : memref<1x1x2x128xf32, #tpu.memory_space<vmem>>, vector<1x1x2x128xf32>,
      %cst_35 = arith.constant 0.000000e+00 : f32
      %65 = vector.broadcast %cst_35 : f32 to vector<1x1x2x128xf32>
      %c0_36 = arith.constant 0 : index
      %c0_37 = arith.constant 0 : index
      %c0_38 = arith.constant 0 : index
      %c0_39 = arith.constant 0 : index
      %66 = vector.load %arg6[%c0_36, %c0_37, %c0_38, %c0_39] : memref<1x1x2x128xf32, #tpu.memory_space<vmem>>, vector<1x1x2x128xf32>
      tpu.vector_store %arg6[%c0_36, %c0_37, %c0_38, %c0_39], %65 {strides = array<i32>} : memref<1x1x2x128xf32, #tpu.memory_space<vmem>>, vector<1x1x2x128xf32>,
    } else {
    }
    %c0 = arith.constant 0 : index
    %c0_1 = arith.constant 0 : index
    %c0_2 = arith.constant 0 : index
    %c0_3 = arith.constant 0 : index
    %3 = vector.load %arg3[%c0, %c0_1, %c0_2, %c0_3] : memref<1x4x2x128xf32, #tpu.memory_space<vmem>>, vector<1x4x2x128xf32>
    %4 = vector.shape_cast %3 : vector<1x4x2x128xf32> to vector<4x2x128xf32>
    %c0_4 = arith.constant 0 : index
    %c0_5 = arith.constant 0 : index
    %c0_6 = arith.constant 0 : index
    %5 = vector.load %arg4[%c0_4, %c0_5, %c0_6] : memref<1x2x128xi8, #tpu.memory_space<vmem>>, vector<1x2x128xi8>
    %6 = vector.shape_cast %5 : vector<1x2x128xi8> to vector<2x128xi8>
    %7 = arith.extui %6 : vector<2x128xi8> to vector<2x128xi32>
    %c1_i32 = arith.constant 1 : i32
    %8 = arith.muli %arg1, %c1_i32 : i32
    %9 = arith.addi %8, %arg2 : i32
    %10 = tpu.iota {dimensions = array<i32: 0>} : vector<2x128xi32>
    %11 = tpu.iota {dimensions = array<i32: 1>} : vector<2x128xi32>
    %c2_i32 = arith.constant 2 : i32
    %12 = arith.muli %9, %c2_i32 : i32
    %13 = vector.broadcast %12 : i32 to vector<2x128xi32>
    %14 = arith.addi %13, %10 : vector<2x128xi32>
    %c128_i32 = arith.constant 128 : i32
    %15 = vector.broadcast %c128_i32 : i32 to vector<2x128xi32>
    %16 = arith.muli %14, %15 : vector<2x128xi32>
    %17 = arith.addi %16, %11 : vector<2x128xi32>
    %c255_i32 = arith.constant 255 : i32
    %18 = vector.broadcast %c255_i32 : i32 to vector<2x128xi32>
    %19 = arith.cmpi ne, %7, %18 : vector<2x128xi32>
    %c256_i32 = arith.constant 256 : i32
    %20 = vector.broadcast %c256_i32 : i32 to vector<2x128xi32>
    %21 = arith.cmpi slt, %17, %20 : vector<2x128xi32>
    %22 = arith.andi %19, %21 : vector<2x128xi1>
    %cst = arith.constant dense<0xFF800000> : vector<2x128xf32>
    %23 = vector.multi_reduction <maximumf>, %4, %cst [0] : vector<4x2x128xf32> to vector<2x128xf32>
    %24 = vector.shape_cast %23 : vector<2x128xf32> to vector<1x2x128xf32>
    %25 = vector.broadcast %24 : vector<1x2x128xf32> to vector<4x2x128xf32>
    %26 = arith.subf %4, %25 : vector<4x2x128xf32>
    %27 = math.exp %26 : vector<4x2x128xf32>
    %cst_7 = arith.constant dense<0.000000e+00> : vector<2x128xf32>
    %28 = vector.multi_reduction <add>, %27, %cst_7 [0] : vector<4x2x128xf32> to vector<2x128xf32>
    %29 = math.log %28 : vector<2x128xf32>
    %c0_i32_8 = arith.constant 0 : i32
    %30 = vector.broadcast %c0_i32_8 : i32 to vector<2x128xi32>
    %31 = arith.select %22, %7, %30 : vector<2x128xi1>, vector<2x128xi32>
    %32 = tpu.iota {dimensions = array<i32: 0>} : vector<4x2x128xi32>
    %33 = vector.shape_cast %31 : vector<2x128xi32> to vector<1x2x128xi32>
    %34 = vector.broadcast %33 : vector<1x2x128xi32> to vector<4x2x128xi32>
    %35 = arith.cmpi eq, %32, %34 : vector<4x2x128xi32>
    %cst_9 = arith.constant 0.000000e+00 : f32
    %36 = vector.broadcast %cst_9 : f32 to vector<4x2x128xf32>
    %37 = arith.select %35, %26, %36 : vector<4x2x128xi1>, vector<4x2x128xf32>
    %cst_10 = arith.constant dense<0.000000e+00> : vector<2x128xf32>
    %38 = vector.multi_reduction <add>, %37, %cst_10 [0] : vector<4x2x128xf32> to vector<2x128xf32>
    %39 = arith.subf %38, %29 : vector<2x128xf32>
    %40 = math.exp %39 : vector<2x128xf32>
    %cst_11 = arith.constant 1.000000e+00 : f32
    %41 = vector.broadcast %cst_11 : f32 to vector<2x128xf32>
    %42 = arith.subf %41, %40 : vector<2x128xf32>
    %43 = arith.mulf %42, %42 : vector<2x128xf32>
    %44 = arith.mulf %43, %39 : vector<2x128xf32>
    %cst_12 = arith.constant 0.000000e+00 : f32
    %45 = vector.broadcast %cst_12 : f32 to vector<2x128xf32>
    %46 = arith.subf %45, %44 : vector<2x128xf32>
    %cst_13 = arith.constant 0.000000e+00 : f32
    %47 = vector.broadcast %cst_13 : f32 to vector<2x128xf32>
    %48 = arith.select %22, %46, %47 : vector<2x128xi1>, vector<2x128xf32>
    %49 = arith.extui %22 : vector<2x128xi1> to vector<2x128xi32>
    %50 = arith.sitofp %49 : vector<2x128xi32> to vector<2x128xf32>
    %c0_14 = arith.constant 0 : index
    %c0_15 = arith.constant 0 : index
    %c0_16 = arith.constant 0 : index
    %c0_17 = arith.constant 0 : index
    %51 = vector.load %arg5[%c0_14, %c0_15, %c0_16, %c0_17] : memref<1x1x2x128xf32, #tpu.memory_space<vmem>>, vector<1x1x2x128xf32>
    %52 = vector.shape_cast %51 : vector<1x1x2x128xf32> to vector<2x128xf32>
    %53 = arith.addf %52, %48 : vector<2x128xf32>
    %c0_18 = arith.constant 0 : index
    %c0_19 = arith.constant 0 : index
    %c0_20 = arith.constant 0 : index
    %c0_21 = arith.constant 0 : index
    %54 = vector.load %arg5[%c0_18, %c0_19, %c0_20, %c0_21] : memref<1x1x2x128xf32, #tpu.memory_space<vmem>>, vector<1x1x2x128xf32>
    %55 = vector.shape_cast %54 : vector<1x1x2x128xf32> to vector<2x128xf32>
    %56 = vector.shape_cast %53 : vector<2x128xf32> to vector<1x1x2x128xf32>
    tpu.vector_store %arg5[%c0_18, %c0_19, %c0_20, %c0_21], %56 {strides = array<i32>} : memref<1x1x2x128xf32, #tpu.memory_space<vmem>>, vector<1x1x2x128xf32>,
    %c0_22 = arith.constant 0 : index
    %c0_23 = arith.constant 0 : index
    %c0_24 = arith.constant 0 : index
    %c0_25 = arith.constant 0 : index
    %57 = vector.load %arg6[%c0_22, %c0_23, %c0_24, %c0_25] : memref<1x1x2x128xf32, #tpu.memory_space<vmem>>, vector<1x1x2x128xf32>
    %58 = vector.shape_cast %57 : vector<1x1x2x128xf32> to vector<2x128xf32>
    %59 = arith.addf %58, %50 : vector<2x128xf32>
    %c0_26 = arith.constant 0 : index
    %c0_27 = arith.constant 0 : index
    %c0_28 = arith.constant 0 : index
    %c0_29 = arith.constant 0 : index
    %60 = vector.load %arg6[%c0_26, %c0_27, %c0_28, %c0_29] : memref<1x1x2x128xf32, #tpu.memory_space<vmem>>, vector<1x1x2x128xf32>
    %61 = vector.shape_cast %60 : vector<1x1x2x128xf32> to vector<2x128xf32>
    %62 = vector.shape_cast %59 : vector<2x128xf32> to vector<1x1x2x128xf32>
    tpu.vector_store %arg6[%c0_26, %c0_27, %c0_28, %c0_29], %62 {strides = array<i32>} : memref<1x1x2x128xf32, #tpu.memory_space<vmem>>, vector<1x1x2x128xf32>,
    return
  }
  func.func @transform_0(%arg0: i32, %arg1: i32, %arg2: i32) -> (i32, i32, i32, i32) {
    %c1_i32 = arith.constant 1 : i32
    %0 = arith.muli %arg1, %c1_i32 : i32
    %1 = arith.addi %0, %arg2 : i32
    %c0_i32 = arith.constant 0 : i32
    %2 = arith.minsi %1, %c0_i32 : i32
    %c0_i32_0 = arith.constant 0 : i32
    %c0_i32_1 = arith.constant 0 : i32
    %c0_i32_2 = arith.constant 0 : i32
    return %arg0, %c0_i32_0, %2, %c0_i32_1 : i32, i32, i32, i32
  }
  func.func @transform_1(%arg0: i32, %arg1: i32, %arg2: i32) -> (i32, i32, i32) {
    %c1_i32 = arith.constant 1 : i32
    %0 = arith.muli %arg1, %c1_i32 : i32
    %1 = arith.addi %0, %arg2 : i32
    %c0_i32 = arith.constant 0 : i32
    %2 = arith.minsi %1, %c0_i32 : i32
    %c0_i32_0 = arith.constant 0 : i32
    %c0_i32_1 = arith.constant 0 : i32
    return %arg0, %2, %c0_i32_0 : i32, i32, i32
  }
  func.func @transform_2(%arg0: i32, %arg1: i32, %arg2: i32) -> (i32, i32, i32, i32) {
    %c0_i32 = arith.constant 0 : i32
    %c0_i32_0 = arith.constant 0 : i32
    %c0_i32_1 = arith.constant 0 : i32
    return %arg0, %arg1, %c0_i32, %c0_i32_0 : i32, i32, i32, i32
  }
  func.func @transform_3(%arg0: i32, %arg1: i32, %arg2: i32) -> (i32, i32, i32, i32) {
    %c0_i32 = arith.constant 0 : i32
    %c0_i32_0 = arith.constant 0 : i32
    %c0_i32_1 = arith.constant 0 : i32
    return %arg0, %arg1, %c0_i32, %c0_i32_0 : i32, i32, i32, i32
  }
}

</mosaic_0001>

<bundles_post_ra>
// kernel: tpu_custom_call.1
= control target key start
LH: loop header
LB: loop body
LE: loop exit
PB: predicated region body
PF: predicated region fallthrough
CT: control target
= control target key end

     0   :  { %9 = vsyncpa [#allocation3], 0  ;;  %s1057_s0 = inlined_call_operand.hbm [shape: f32[2,4,2,128], index: 0, kind: input, shape index: {}]   ;;  %s1058_s1 = inlined_call_operand.vmem [shape: u8[2,2,128], index: 1, kind: input, shape index: {}]   ;;  %s1059_s2 = inlined_call_operand.hbm [shape: f32[2,1,2,128], index: 2, kind: output, shape index: {0}]   ;;  %s1060_s3 = inlined_call_operand.hbm [shape: f32[2,1,2,128], index: 3, kind: output, shape index: {1}]  }
   0x1   :  { %11 = vsyncpa [#allocation3 + $0x1], 0 }
   0x2   :  { %12 = vsyncpa [#allocation4], 0 }
   0x3   :  { %14 = vsyncpa [#allocation4 + $0x1], 0 }
   0x4   :  { %15 = vsyncpa [#allocation7], 0 }
   0x5   :  { %17 = vsyncpa [#allocation7 + $0x1], 0  ;;  %s807_s12 = smov 0   ;;  %s809_s13 = smov 0  }
   0x6   :  { %s811_s14 = smov 0   ;;  %s813_s15 = smov 0  }
   0x7   :  { %s815_s16 = smov 0   ;;  %s817_s17 = smov 0  }
   0x8 LB: > { %s534_s18 = sadd.s32 4294967295, %s779_s17   ;;  %s535_s19 = sadd.s32 4294967294, %s779_s17   ;;  %s779_s17 = sphi %s817_s17, %s23_s17   ;;  %s775_s16 = sphi %s815_s16, %s1077_s16   ;;  %s771_s15 = sphi %s813_s15, %s1076_s15   ;;  %s767_s14 = sphi %s811_s14, %s1075_s14   ;;  %s763_s13 = sphi %s809_s13, %s1074_s13   ;;  %s759_s12 = sphi %s807_s12, %s1073_s12  }
   0x9   : > { %s42_s20 = sadd.s32 1, %s775_s16  ;;  %s57_s21 = sadd.s32 1, %s767_s14 }
   0xa   : > { %p44_p0 = scmp.ge.s32.totalorder %s42_s20, 2  ;;  %p64_p1 = scmp.ne.s32.totalorder %s767_s14, %s763_s13 }
   0xb   : > { %p65_p2 = scmp.eq.s32.totalorder %s779_s17, 0  ;;  %p70_p3 = scmp.ne.s32.totalorder %s763_s13, %s759_s12 }
   0xc   : > { %s1079_s20 = smov (%p44_p0, %s42_s20), 0  ;;  %p71_p5 = scmp.eq.s32.totalorder %s534_s18, 0 }
   0xd   : > { %p848_p4 = por %p65_p2, %p64_p1  ;;  %s52_s23 = ssub.s32 %s775_s16, %s1079_s20 }
   0xe   : > { %p130_p6 = scmp.eq.s32.totalorder %s534_s18, 1  ;;  %p55_p7 = scmp.eq.s32.totalorder %s52_s23, 0 }
   0xf   : > { %p854_p8 = por %p71_p5, %p70_p3  ;;  %p136_p10 = scmp.eq.s32.totalorder %s535_s19, 1 }
  0x10   : > { %p858_p9 = por %p130_p6, %p64_p1  ;;  %p570_p13 = scmp.lt.s32.totalorder %s779_s17, 2 }
  0x11   : > { %s863_s26 = scalar_select %p55_p7, %s767_s14, %s57_s21  }
  0x12   : > { %s1064_s25 = scalar_select %p858_p9, 1, 0 }
  0x13   : > { %p865_p11 = por %p136_p10, %p70_p3  ;;  %s184_s28 = sand.u32 1, %s767_s14  }
  0x14   : > { %s538_s29 = sshll.u32 %s184_s28, 3  ;;  %s552_s30 = sshll.u32 %s775_s16, 7 }
  0x15   : > { %s1065_s27 = scalar_select %p865_p11, 1, 0 }
  0x16   : > { %s876_s6 = scalar_lea.hbm %s1057_s0, %s552_s30  ;;  %s188_s7 = scalar_lea.vmem [#allocation2], %s538_s29 }
  0x17   : > { %s199_s8 = sshll.u32 %s188_s7, 4  ;;  %p882_p0 = pnand %p570_p13, %p848_p4  ;;  %s878_s8 = int_to_ptr.vmem [resolvable:$true] %s199_s8 }
  0x18   : > { %s887_s10 = scalar_lea.sflag [#allocation3], %s184_s28  ;;  %s635_s11 = scalar_lea.hbm %s876_s6, 128 }
  0x19   : > { %p636_p2 = scmp.ne.s32.totalorder %s876_s6, %s635_s11  ;;  %p637_p3 = pneg %p882_p0 }
  0x1a   : > { %s640_s21 = scalar_lea.hbm %s1057_s0, 256  ;;  %p641_p4 = scmp.lt.u32.totalorder %s876_s6, %s1057_s0 }
  0x1b   : > { %p638_p5 = pnand %p637_p3, %p636_p2  ;;  %p642_p7 = scmp.lt.u32.totalorder %s640_s21, %s635_s11 }
  0x1c   : > { %p644_p13 = scmp.lt.u32.totalorder %s635_s11, %s876_s6 }
  0x1d   : > { %p639_p6 = pneg %p638_p5  ;;  %p643_p10 = por %p642_p7, %p641_p4 }
  0x1f   : > { %p645_p12 = por %p644_p13, %p643_p10 }
  0x21   : > { %p646_p1 = pnand %p645_p12, %p639_p6 }
  0x23   : > { %649 = shalt.err (!%p646_p1)
}
  0x24   : > { %s650_s28 = scalar_lea.vmem %s878_s8, 128  ;;  %s781_s29 = smov [#allocation2]  }
  0x25   : > { %p651_p2 = scmp.ne.s32.totalorder %s878_s8, %s650_s28  ;;  %s655_s30 = sshll.u32 %s781_s29, 4  ;;  %s656_s30 = int_to_ptr.vmem [resolvable:$false] %s655_s30 }
  0x26   : > { %s657_s4 = scalar_lea.vmem %s656_s30, 256  ;;  %p658_p9 = scmp.lt.s32.totalorder %s878_s8, %s656_s30 }
  0x27   : > { %p653_p5 = pnand %p651_p2, %p637_p3  ;;  %p659_p4 = scmp.lt.s32.totalorder %s657_s4, %s650_s28 }
  0x29   : > { %p654_p11 = pneg %p653_p5  ;;  %p660_p7 = por %p659_p4, %p658_p9 }
  0x2b   : > { %p661_p10 = pnand %p660_p7, %p654_p11 }
  0x2d   : > { %664 = shalt.err (!%p661_p10)
}
  0x2e   : > { %s782_s5 = smov 32   ;;  %s783_s7 = smov 2  }
  0x2f   : > { %562 = dma.hbm_to_vmem [thread:$0]  (!%p882_p0), %s876_s6, 128, %s878_s8, %s887_s10, %s782_s5, %s782_s5, %s783_s7  }
  0x30   : > { %p222_p12 = scmp.lt.s32.totalorder %s779_s17, 3  ;;  %p1067_p1 = scmp.ge.s32.totalorder %s779_s17, 1 }
  0x32   : > { %p223_p3 = pnand %p1067_p1, %p222_p12 }
  0x33   : > { %s919_s11 = sand.u32 (!%p223_p3), 1, %s763_s13  }
  0x34   : > { %226 = sbr.rel (%p223_p3) target bundleno = 157 (0x9d), region = 28  ;;  %s542_s18 = sshll.u32 (!%p223_p3), %s919_s11, 3 }
  0x35   : > { %s229_s19 = scalar_lea.sflag (!%p223_p3), [#allocation3], %s919_s11  ;;  %s232_s21 = scalar_lea.vmem (!%p223_p3), [#allocation2], %s542_s18 }
  0x3b   : > { %746 = dma.done.wait (%p854_p8), %s229_s19, 128  }
  0x3c   : > { %748 = vsyncadd (%p854_p8), %s229_s19, 4294967168  ;;  %s543_s6 = sshll.u32 %s919_s11, 1  ;;  %p275_p9 = scmp.lt.s32.totalorder %s771_s15, 1  ;;  %v298_v0 = vlaneseq  ;;  %v784_v1 = vmov 0.0   ;;  %vm310_vm0 = vcmask 1041408  }
  0x3d   : > { %s930_s9 = scalar_lea.vmem [#allocation5], %s543_s6  ;;  %s933_s10 = scalar_lea.vmem [#allocation6], %s543_s6  ;;  %v290_v5 = vld [vmem:[%s232_s21] sm:$0x3]  ;;  %v291_v6 = vld [vmem:[%s232_s21 + $0x2] sm:$0x3] }
  0x3e   : > { %s276_s8 = scalar_select %p275_p9, %s771_s15, 1  ;;  %288 = vst [vmem:[%s930_s9] sm:$0x3] %v784_v1  ;;  %v299_v2 = vshrl.u32 %v298_v0, 7  ;;  %289 = vst [vmem:[%s933_s10] sm:$0x3] %v784_v1  ;;  %v301_v3 = vand.u32 127, %v298_v0  ;;  %v311_v11 = vsel %vm310_vm0, %v290_v5, -inf }
  0x3f   : > { %v292_v7 = vld [vmem:[%s232_s21 + $0x4] sm:$0x3]  ;;  %v293_v9 = vld [vmem:[%s232_s21 + $0x6] sm:$0x3]  ;;  %v312_v13 = vsel %vm310_vm0, %v291_v6, -inf  ;;  %s548_s28 = sshll.u32 %s771_s15, 5 }
  0x40   : > { %v305_v4 = vmul.u32 128, %v299_v2  ;;  %s280_s23 = scalar_lea.vmem %s1058_s1, %s276_s8  ;;  %v313_v14 = vsel %vm310_vm0, %v292_v7, -inf  ;;  %v314_v15 = vsel %vm310_vm0, %v293_v9, -inf  ;;  %v315_v16 = vmax.f32 %v311_v11, %v312_v13  ;;  %s405_s29 = sshll.u32 %s933_s10, 4  ;;  %s961_s29 = int_to_ptr.vmem [resolvable:$true] %s405_s29 }
  0x41   : > { %v294_v10 = vld [vmem:[%s280_s23] sm:$0x1]  ;;  %v316_v17 = vmax.f32 %v313_v14, %v314_v15  ;;  %s959_s5 = scalar_lea.hbm %s1060_s3, %s548_s28  ;;  %s377_s7 = scalar_lea.sflag [#allocation7], %s919_s11 }
  0x42   : > { %v306_v8 = vadd.s32 %v305_v4, %v301_v3  ;;  %v295_v12 = vunpack.c.0.s8 %v294_v10  ;;  %s665_s18 = scalar_lea.vmem %s961_s29, 32  ;;  %p1070_p11 = scmp.ne.s32.totalorder %s1064_s25, 0 }
  0x43   : > { %v317_v19 = vmax.f32 %v315_v16, %v316_v17  ;;  %p666_p8 = scmp.ne.s32.totalorder %s961_s29, %s665_s18  ;;  %s785_s19 = smov [#allocation6]  }
  0x44   : > { %v296_v18 = vand.u32 255, %v295_v12  ;;  %vm308_vm1 = vcmp.lt.s32.totalorder %v306_v8, 256  ;;  %s669_s21 = sshll.u32 %s785_s19, 4  ;;  %s670_s21 = int_to_ptr.vmem [resolvable:$false] %s669_s21 }
  0x45   : > { %v368_v20 = vld [vmem:[%s933_s10] sm:$0x3]  ;;  %v318_v22 = vsub.f32 %v290_v5, %v317_v19  ;;  %v319_v23 = vsub.f32 %v291_v6, %v317_v19  ;;  %v320_v24 = vsub.f32 %v292_v7, %v317_v19  ;;  %v950_v25 = vsub.f32 %v293_v9, %v317_v19  ;;  %p667_p0 = pnand %p666_p8, %p1070_p11  ;;  %s671_s6 = scalar_lea.vmem %s670_s21, 64 }
  0x46   : > { %vm307_vm2 = vcmp.ne.s32.totalorder %v296_v18, 255  ;;  %p672_p13 = scmp.lt.s32.totalorder %s961_s29, %s670_s21  ;;  %p673_p2 = scmp.lt.s32.totalorder %s671_s6, %s665_s18 }
  0x47   : > { %vm946_vm3 = vmand %vm307_vm2, %vm308_vm1  ;;  %v322_v27 = vmul.f32 1.442695, %v318_v22  ;;  %v324_v28 = vmul.f32 1.442695, %v319_v23  ;;  %v326_v29 = vmul.f32 1.442695, %v320_v24  ;;  %p668_p6 = pneg %p667_p0 }
  0x48   : > { %v545_v26 = vsel %vm946_vm3, 1.0, %v784_v1  ;;  %v328_v31 = vmul.f32 1.442695, %v950_v25  ;;  %p674_p5 = por %p673_p2, %p672_p13 }
  0x49   : > { %v369_v30 = vadd.f32 %v545_v26, %v368_v20  ;;  %623 = vpow2.f32 %v322_v27 }
  0x4a   : > { %625 = vpow2.f32 %v324_v28  ;;  %p675_p4 = pnand %p674_p5, %p668_p6 }
  0x4b   : > { %370 = vst [vmem:[%s933_s10] sm:$0x3] %v369_v30 }
  0x4c   : > { %678 = shalt.err (!%p675_p4)
}
  0x4d   : > { %s679_s8 = scalar_lea.hbm %s959_s5, 32  ;;  %s683_s22 = scalar_lea.hbm %s1060_s3, 64 }
  0x4e   : > { %p680_p7 = scmp.ne.s32.totalorder %s959_s5, %s679_s8  ;;  %p684_p1 = scmp.lt.u32.totalorder %s959_s5, %s1060_s3 }
  0x4f   : > { %p685_p3 = scmp.lt.u32.totalorder %s683_s22, %s679_s8  ;;  %p687_p8 = scmp.lt.u32.totalorder %s679_s8, %s959_s5 }
  0x50   : > { %p681_p10 = pnand %p680_p7, %p1070_p11 }
  0x51   : > { %p686_p9 = por %p685_p3, %p684_p1 }
  0x52   : > { %p682_p12 = pneg %p681_p10 }
  0x53   : > { %p688_p0 = por %p687_p8, %p686_p9 }
  0x55   : > { %p689_p6 = pnand %p688_p0, %p682_p12 }
  0x57   : > { %692 = shalt.err (!%p689_p6)
}
  0x58   : > { %556 = dma.vmem_to_hbm [thread:$0]  (%p1070_p11), %s961_s29, 32, %s959_s5, %s377_s7   ;;  %627 = vpow2.f32 %v326_v29  ;;  %v339_v32 = vsel %vm946_vm3, %v296_v18, 0  ;;  %v624_v33 = vpop.eup %623  ;;  %v365_v0 = vld [vmem:[%s930_s9] sm:$0x3] }
  0x59   : > { %629 = vpow2.f32 %v328_v31  ;;  %v626_v34 = vpop.eup %625  ;;  %vm340_vm4 = vcmp.eq.s32.totalorder %v339_v32, 0  ;;  %vm341_vm5 = vcmp.eq.s32.totalorder %v339_v32, 1  ;;  %v330_v35 = vsel %vm310_vm0, %v624_v33, 0.0  ;;  %s391_s29 = sshll.u32 %s930_s9, 4  ;;  %s1007_s7 = scalar_lea.hbm %s1059_s2, %s548_s28  ;;  %s1009_s29 = int_to_ptr.vmem [resolvable:$true] %s391_s29 }
  0x5a   : > { %v331_v37 = vsel %vm310_vm0, %v626_v34, 0.0  ;;  %v344_v41 = vsel %vm340_vm4, %v318_v22, 0.0  ;;  %v345_v42 = vsel %vm341_vm5, %v319_v23, 0.0  ;;  %vm342_vm6 = vcmp.eq.s32.totalorder %v339_v32, 2  ;;  %s372_s18 = scalar_lea.sflag [#allocation4], %s919_s11  ;;  %s693_s19 = scalar_lea.vmem %s1009_s29, 32 }
  0x5b   : > { %v332_v39 = vadd.f32 %v331_v37, %v330_v35  ;;  %v348_v45 = vsel %vm310_vm0, %v344_v41, 0.0  ;;  %v349_v46 = vsel %vm310_vm0, %v345_v42, 0.0  ;;  %v346_v48 = vsel %vm342_vm6, %v320_v24, 0.0  ;;  %p694_p13 = scmp.ne.s32.totalorder %s1009_s29, %s693_s19  ;;  %s786_s21 = smov [#allocation5]  }
  0x5c   : > { %vm343_vm7 = vcmp.eq.s32.totalorder %v339_v32, 3  ;;  %v350_v49 = vadd.f32 %v349_v46, %v348_v45  ;;  %v351_v50 = vsel %vm310_vm0, %v346_v48, 0.0  ;;  %s697_s6 = sshll.u32 %s786_s21, 4  ;;  %s698_s6 = int_to_ptr.vmem [resolvable:$false] %s697_s6 }
  0x5d   : > { %v347_v51 = vsel %vm343_vm7, %v950_v25, 0.0  ;;  %p695_p2 = pnand %p694_p13, %p1070_p11  ;;  %s699_s15 = scalar_lea.vmem %s698_s6, 64 }
  0x5e   : > { %v352_v52 = vadd.f32 %v351_v50, %v350_v49  ;;  %v353_v53 = vsel %vm310_vm0, %v347_v51, 0.0  ;;  %p700_p4 = scmp.lt.s32.totalorder %s1009_s29, %s698_s6  ;;  %p701_p7 = scmp.lt.s32.totalorder %s699_s15, %s693_s19 }
  0x5f   : > { %p696_p5 = pneg %p695_p2 }
  0x60   : > { %v354_v54 = vadd.f32 %v353_v53, %v352_v52  ;;  %p702_p10 = por %p701_p7, %p700_p4 }
  0x62   : > { %v628_v36 = vpop.eup %627  ;;  %p703_p12 = pnand %p702_p10, %p696_p5 }
  0x63   : > { %v630_v38 = vpop.eup %629  ;;  %v333_v40 = vsel %vm310_vm0, %v628_v36, 0.0 }
  0x64   : > { %v335_v43 = vsel %vm310_vm0, %v630_v38, 0.0  ;;  %v334_v44 = vadd.f32 %v333_v40, %v332_v39 }
  0x66   : > { %v336_v47 = vadd.f32 %v335_v43, %v334_v44 }
  0x68   : > { %631 = vlog2.f32 %v336_v47 }
  0x72   : > { %v632_v55 = vpop.eup %631 }
  0x73   : > { %v338_v56 = vmul.f32 0.6931472, %v632_v55 }
  0x75   : > { %v355_v57 = vsub.f32 %v354_v54, %v338_v56 }
  0x77   : > { %v356_v58 = vmul.f32 1.442695, %v355_v57 }
  0x79   : > { %633 = vpow2.f32 %v356_v58 }
  0x83   : > { %v634_v59 = vpop.eup %633 }
  0x84   : > { %v358_v60 = vsub.f32 1.0, %v634_v59 }
  0x86   : > { %v359_v61 = vmul.f32 %v358_v60, %v358_v60 }
  0x88   : > { %v360_v62 = vmul.f32 %v359_v61, %v355_v57 }
  0x8a   : > { %v361_v63 = vsub.f32 0.0, %v360_v62 }
  0x8c   : > { %v362_v1 = vsel %vm946_vm3, %v361_v63, 0.0 }
  0x8d   : > { %v366_v2 = vadd.f32 %v365_v0, %v362_v1 }
  0x8f   : > { %367 = vst [vmem:[%s930_s9] sm:$0x3] %v366_v2 }
  0x90   : > { %706 = shalt.err (!%p703_p12)
}
  0x91   : > { %s707_s11 = scalar_lea.hbm %s1007_s7, 32  ;;  %s711_s8 = scalar_lea.hbm %s1059_s2, 64 }
  0x92   : > { %p708_p1 = scmp.ne.s32.totalorder %s1007_s7, %s707_s11  ;;  %p712_p8 = scmp.lt.u32.totalorder %s1007_s7, %s1059_s2 }
  0x93   : > { %p713_p0 = scmp.lt.u32.totalorder %s711_s8, %s707_s11  ;;  %p715_p13 = scmp.lt.u32.totalorder %s707_s11, %s1007_s7 }
  0x94   : > { %p709_p3 = pnand %p708_p1, %p1070_p11 }
  0x95   : > { %p714_p6 = por %p713_p0, %p712_p8 }
  0x96   : > { %p710_p9 = pneg %p709_p3 }
  0x97   : > { %p716_p2 = por %p715_p13, %p714_p6 }
  0x99   : > { %p717_p5 = pnand %p716_p2, %p710_p9 }
  0x9b   : > { %720 = shalt.err (!%p717_p5)
}
  0x9c   : > { %555 = dma.vmem_to_hbm [thread:$0]  (%p1070_p11), %s1009_s29, 32, %s1007_s7, %s372_s18  }
  0x9d PF: > { %s417_s22 = sand.u32 1, %s759_s12   ;;  %p1071_p4 = scmp.ne.s32.totalorder %s1065_s27, 0 }
  0x9e   : > { %p1072_p7 = scmp.ge.s32.totalorder %s779_s17, 2  ;;  %s418_s23 = scalar_lea.sflag [#allocation4], %s417_s22 }
  0xa0   : > { %p564_p10 = pnand %p1072_p7, %p1071_p4 }
  0xa2   : > { %750 = dma.done.wait (!%p564_p10), %s418_s23, 32  }
  0xa3   : > { %752 = vsyncadd (!%p564_p10), %s418_s23, 4294967264  ;;  %s427_s30 = scalar_lea.sflag [#allocation7], %s417_s22 }
  0xa4   : > { %754 = dma.done.wait (!%p564_p10), %s427_s30, 32  }
  0xa5   : > { %756 = vsyncadd (!%p564_p10), %s427_s30, 4294967264  ;;  %s23_s17 = sadd.s32 1, %s779_s17   ;;  %s1073_s12 = smov %s763_s13 }
  0xa6   : > { %p20_p12 = scmp.ge.s32.totalorder %s23_s17, 4   ;;  %s1074_s13 = smov %s767_s14 }
  0xa7   : > { %s1075_s14 = smov %s863_s26  ;;  %s1076_s15 = smov %s775_s16 }
  0xa8   : > { %s1077_s16 = smov %s1079_s20  ;;  %22 = sbr.rel (!%p20_p12) target bundleno = 8 (0x8), region = 97 }
  0xaf   :  { %432 = vsyncpa [#allocation3], 1 }
  0xb0   :  { %434 = vsyncpa [#allocation3 + $0x1], 1 }
  0xb1   :  { %435 = vsyncpa [#allocation4], 1 }
  0xb2   :  { %437 = vsyncpa [#allocation4 + $0x1], 1 }
  0xb3   :  { %438 = vsyncpa [#allocation7], 1 }
  0xb4   :  { %440 = vsyncpa [#allocation7 + $0x1], 1 }

</bundles_post_ra>
